<compile_context>
chip_gen: v7x
topology: tpu7x:2x2x1
jax: 0.10.0
libtpu: 0.0.40
codegen_flags: <defaults>
</compile_context>

<pallas_src>
import jax
import jax.numpy as jnp
from jax import lax
from jax.experimental import pallas as pl
from jax.experimental.pallas import tpu as pltpu


def mmaa_loss_kernel(x_ref, c_ref, sms_ref, out_ref):
    X = x_ref[0]           # (s_block, T, V) f32
    Ct = c_ref[...]        # (k, V) f32, forward-softmaxed over V outside (lane-dense)
    Sm_raw = sms_ref[0]    # (s_block, k, V) raw parameter

    # fused forward softmax over k (axis=-2 of (M,S,k,V)); EUP reciprocal, not a divide
    mk = jnp.max(Sm_raw, axis=1, keepdims=True)
    ek = jnp.exp(Sm_raw - mk)
    inv = pl.reciprocal(jnp.sum(ek, axis=1, keepdims=True), approx=True)
    Sm = ek * inv                                        # (s_block, k, V) f32

    s_block, T, V = X.shape
    k = Ct.shape[0]
    rows = s_block * T

    # A = X @ softmax(C): one tall bf16 MXU matmul over the whole subject block,
    # contracting the V axis of both operands (C stays lane-dense as (k, V)).
    Xb = X.reshape(rows, V).astype(jnp.bfloat16)
    Cb = Ct.astype(jnp.bfloat16)
    A = lax.dot_general(Xb, Cb, (((1,), (1,)), ((), ())),
                        preferred_element_type=jnp.float32)      # (rows, k) f32
    A = A.reshape(s_block, T, k).astype(jnp.bfloat16)

    # Xhat[s] = A[s] @ softmax(Sms[m, s]): batched bf16 contraction, f32 accumulate.
    # TODO(synk): this lowers to s_block small (T,k)x(k,V) matmuls; if the MXU push
    #             slot saturates at production shapes, move the k=16 contraction to
    #             a VPU broadcast-MAC loop over k.
    Xhat = jnp.einsum("stk,skv->stv", A, Sm.astype(jnp.bfloat16),
                      preferred_element_type=jnp.float32)        # (s_block, T, V) f32

    # residual against the *f32* X; lane-dense per-(m, sb) partial output
    R = X - Xhat
    Rsq = (R * R).reshape(rows // 8, 8, V)
    out_ref[0, 0] = jnp.sum(Rsq, axis=0)                         # (8, V)


def _vmem_capacity_bytes(default=64 << 20):
    """Physical VMEM per TensorCore; falls back to the v7x value (64 MiB)."""
    try:
        info = pltpu.get_tpu_info()
        cap = getattr(info, "vmem_capacity_bytes", None)
        if cap:
            return int(cap)
    except Exception:
        pass
    return default


def _choose_subject_block(S, T, V, k, itemsize=4, budget_bytes=None):
    """Largest subject block whose pipelined inputs + live intermediates fit VMEM."""
    if budget_bytes is None:
        budget_bytes = max(4 << 20, _vmem_capacity_bytes() // 3)
    lanes = 128
    best = 1
    for d in range(1, S + 1):
        io = 2 * d * (T * V + k * V) * itemsize                       # double-buffered inputs
        inter = d * (3 * k * V + T * lanes + 3 * T * V) * itemsize    # Sm/ek, padded A, Xhat/R/Rsq
        if io + inter <= budget_bytes:
            best = d
    return best


def mmaa_forward(X, C, Sms, *, s_block=None):
    """X: (M, S, T, V) f32, C: (V, k) f32, Sms: (M, S, k, V) f32 -> scalar loss."""
    M, S, T, V = X.shape
    k = C.shape[1]
    assert T % 8 == 0, "T must be a multiple of 8 for the sublane-aligned reshape"
    assert Sms.shape == (M, S, k, V)

    # derive VMEM limits from the chip: <= ~48 MiB on v7x (64 MiB physical),
    # up to 96 MiB on v5e/v6e (128 MiB physical).
    vmem_cap = _vmem_capacity_bytes()
    vmem_limit = int(min(96 << 20, (vmem_cap * 3) // 4))

    if s_block is None:
        s_block = _choose_subject_block(S, T, V, k, budget_bytes=vmem_limit // 2)
    s_block = max(1, min(int(s_block), S))

    # non-divisor S: zero-pad the subject axis (padded subjects contribute 0 loss:
    # X rows are 0 -> A = 0 -> Xhat = 0 -> R = 0).
    n_sb = pl.cdiv(S, s_block)
    S_pad = n_sb * s_block
    if S_pad != S:
        pad = S_pad - S
        X = jnp.pad(X, ((0, 0), (0, pad), (0, 0), (0, 0)))
        Sms = jnp.pad(Sms, ((0, 0), (0, pad), (0, 0), (0, 0)))

    # tiny (V, k) forward softmax + transpose to lane-dense (k, V) stays outside;
    # the big (M, S, k, V) Sms softmax is fused into the kernel.
    Ct = jax.nn.softmax(C.astype(jnp.float32), axis=0).T            # (k, V)

    partials = pl.pallas_call(
        mmaa_loss_kernel,
        out_shape=jax.ShapeDtypeStruct((M, n_sb, 8, V), jnp.float32),
        grid_spec=pltpu.PrefetchScalarGridSpec(
            num_scalar_prefetch=0,
            grid=(M, n_sb),
            in_specs=[
                pl.BlockSpec((1, s_block, T, V), lambda m, sb: (m, sb, 0, 0)),
                pl.BlockSpec((k, V), lambda m, sb: (0, 0)),
                pl.BlockSpec((1, s_block, k, V), lambda m, sb: (m, sb, 0, 0)),
            ],
            out_specs=pl.BlockSpec((1, 1, 8, V), lambda m, sb: (m, sb, 0, 0)),
        ),
        compiler_params=pltpu.CompilerParams(
            # per-(m, sb) partials are fully independent -> both axes parallel
            # (sharded across v7x's 2 TensorCores; neutral on v5e/v6e).
            dimension_semantics=("parallel", "parallel"),
            vmem_limit_bytes=vmem_limit,
        ),
    )(X, Ct, Sms)

    # single final cross-lane/sublane reduction over the (M, n_sb, 8, V) partials
    return jnp.sum(partials)


def init_params(key, V, k, numModalities, numSubjects):
    """Mirror MMAA.__init__: params are softmax(rand(...)) along the stated axes."""
    k1, k2 = jax.random.split(key)
    C_raw = jax.random.uniform(k1, (V, k), dtype=jnp.float32)
    Sms_raw = jax.random.uniform(
        k2, (numModalities, numSubjects, k, V), dtype=jnp.float32
    )
    C = jax.nn.softmax(C_raw, axis=0)
    Sms = jax.nn.softmax(Sms_raw, axis=-2)
    return C, Sms


def reference_forward(X, C, Sms):
    """Pure-JAX reference of the PyTorch forward (for validation)."""
    M = X.shape[0]
    C_soft = jax.nn.softmax(C, axis=0)
    Sms_soft = jax.nn.softmax(Sms, axis=-2)
    loss = 0.0
    for m in range(M):
        A = jnp.einsum("stv,vk->stk", X[m], C_soft)
        Xhat = jnp.einsum("stk,skv->stv", A, Sms_soft[m])
        R = X[m] - Xhat
        # matrix_norm(...)**2 per subject, summed over subjects
        loss = loss + jnp.sum(jnp.sum(R * R, axis=(-2, -1)))
    return loss


if __name__ == "__main__":
    # small synthetic shapes consistent with the module's forward
    V = 128          # number of voxels/sensors (shared across modalities)
    T = 32           # number of time points
    k = 16           # number of archetypes
    numModalities = 3
    numSubjects = 8  # enough subjects to exercise the subject-block batching

    key = jax.random.PRNGKey(0)
    kx, kp = jax.random.split(key)

    # synthetic data X[m][s] : (T, V)
    # TODO(synk): the toy dataset allows a different T per modality (e.g. fMRI);
    # here all modalities share T so X stacks into one (M, S, T, V) array.
    X = jax.random.normal(kx, (numModalities, numSubjects, T, V), dtype=jnp.float32)

    C, Sms = init_params(kp, V, k, numModalities, numSubjects)

    loss = mmaa_forward(X, C, Sms)
    jax.block_until_ready(loss)

    ref = reference_forward(X, C, Sms)
    # bf16 MXU operands + approx reciprocal vs f32 reference: loosened tolerance
    assert jnp.allclose(loss, ref, rtol=5e-3, atol=1e-1), (loss, ref)

    print("KERNEL_OK")
</pallas_src>

<mosaic_0001>
module attributes {stable_mosaic.version = 11 : i64} {
  func.func @mmaa_loss_kernel(%arg0: i32, %arg1: i32, %arg2: memref<1x8x32x128xf32, #tpu.memory_space<vmem>>, %arg3: memref<16x128xf32, #tpu.memory_space<vmem>>, %arg4: memref<1x8x16x128xf32, #tpu.memory_space<vmem>>, %arg5: memref<1x1x8x128xf32, #tpu.memory_space<vmem>>) attributes {dimension_semantics = [#tpu.dimension_semantics<parallel>, #tpu.dimension_semantics<parallel>], iteration_bounds = array<i64: 3, 1>, scalar_prefetch = 0 : i64, scratch_operands = 0 : i64, tpu.core_type = #tpu.core_type<tc>, window_params = [{transform_indices = @transform_0, window_bounds = array<i64: 1, 8, 32, 128>}, {pipeline_mode = #tpu.pipeline_mode<synchronous>, transform_indices = @transform_1, window_bounds = array<i64: 16, 128>}, {transform_indices = @transform_2, window_bounds = array<i64: 1, 8, 16, 128>}, {transform_indices = @transform_3, window_bounds = array<i64: 1, 1, 8, 128>}]} {
    %c0 = arith.constant 0 : index
    %c0_0 = arith.constant 0 : index
    %c0_1 = arith.constant 0 : index
    %c0_2 = arith.constant 0 : index
    %0 = vector.load %arg2[%c0, %c0_0, %c0_1, %c0_2] : memref<1x8x32x128xf32, #tpu.memory_space<vmem>>, vector<1x8x32x128xf32>
    %1 = vector.shape_cast %0 : vector<1x8x32x128xf32> to vector<8x32x128xf32>
    %c0_3 = arith.constant 0 : index
    %c0_4 = arith.constant 0 : index
    %2 = vector.load %arg3[%c0_3, %c0_4] : memref<16x128xf32, #tpu.memory_space<vmem>>, vector<16x128xf32>
    %c0_5 = arith.constant 0 : index
    %c0_6 = arith.constant 0 : index
    %c0_7 = arith.constant 0 : index
    %c0_8 = arith.constant 0 : index
    %3 = vector.load %arg4[%c0_5, %c0_6, %c0_7, %c0_8] : memref<1x8x16x128xf32, #tpu.memory_space<vmem>>, vector<1x8x16x128xf32>
    %4 = vector.shape_cast %3 : vector<1x8x16x128xf32> to vector<8x16x128xf32>
    %cst = arith.constant dense<0xFF800000> : vector<8x128xf32>
    %5 = vector.multi_reduction <maximumf>, %4, %cst [1] : vector<8x16x128xf32> to vector<8x128xf32>
    %6 = vector.shape_cast %5 : vector<8x128xf32> to vector<8x1x128xf32>
    %7 = vector.broadcast %6 : vector<8x1x128xf32> to vector<8x16x128xf32>
    %8 = arith.subf %4, %7 : vector<8x16x128xf32>
    %9 = math.exp %8 : vector<8x16x128xf32>
    %cst_9 = arith.constant dense<0.000000e+00> : vector<8x128xf32>
    %10 = vector.multi_reduction <add>, %9, %cst_9 [1] : vector<8x16x128xf32> to vector<8x128xf32>
    %11 = vector.shape_cast %10 : vector<8x128xf32> to vector<8x1x128xf32>
    %12 = tpu.reciprocal %11 {approx = true} : vector<8x1x128xf32> -> vector<8x1x128xf32>
    %13 = vector.broadcast %12 : vector<8x1x128xf32> to vector<8x16x128xf32>
    %14 = arith.mulf %9, %13 : vector<8x16x128xf32>
    %15 = vector.shape_cast %1 : vector<8x32x128xf32> to vector<256x128xf32>
    %16 = arith.truncf %15 : vector<256x128xf32> to vector<256x128xbf16>
    %17 = arith.truncf %2 : vector<16x128xf32> to vector<16x128xbf16>
    %cst_10 = arith.constant dense<0.000000e+00> : vector<256x16xf32>
    %18 = tpu.matmul %16, %17, %cst_10 {dimension_numbers = #tpu.dot_dimension_numbers<[1], [1], [0], [0], [0, 0, 1, 0], [], []>} : vector<256x128xbf16>, vector<16x128xbf16>, vector<256x16xf32> -> vector<256x16xf32>
    %19 = vector.shape_cast %18 : vector<256x16xf32> to vector<8x32x16xf32>
    %20 = arith.truncf %19 : vector<8x32x16xf32> to vector<8x32x16xbf16>
    %21 = arith.truncf %14 : vector<8x16x128xf32> to vector<8x16x128xbf16>
    "tpu.trace_start"() <{level = 10 : i32, message = "stk,skv->stv"}> : () -> ()
    %cst_11 = arith.constant dense<0.000000e+00> : vector<8x32x128xf32>
    %22 = tpu.matmul %20, %21, %cst_11 {dimension_numbers = #tpu.dot_dimension_numbers<[2], [1], [1], [2], [0, 0, 0, 1, 1, 2], [0], [0]>} : vector<8x32x16xbf16>, vector<8x16x128xbf16>, vector<8x32x128xf32> -> vector<8x32x128xf32>
    "tpu.trace_stop"() : () -> ()
    %23 = arith.subf %1, %22 : vector<8x32x128xf32>
    %24 = arith.mulf %23, %23 : vector<8x32x128xf32>
    %25 = vector.shape_cast %24 : vector<8x32x128xf32> to vector<32x8x128xf32>
    %cst_12 = arith.constant dense<0.000000e+00> : vector<8x128xf32>
    %26 = vector.multi_reduction <add>, %25, %cst_12 [0] : vector<32x8x128xf32> to vector<8x128xf32>
    %c0_13 = arith.constant 0 : index
    %c0_14 = arith.constant 0 : index
    %c0_15 = arith.constant 0 : index
    %c0_16 = arith.constant 0 : index
    %27 = vector.load %arg5[%c0_13, %c0_14, %c0_15, %c0_16] : memref<1x1x8x128xf32, #tpu.memory_space<vmem>>, vector<1x1x8x128xf32>
    %28 = vector.shape_cast %27 : vector<1x1x8x128xf32> to vector<8x128xf32>
    %29 = vector.shape_cast %26 : vector<8x128xf32> to vector<1x1x8x128xf32>
    tpu.vector_store %arg5[%c0_13, %c0_14, %c0_15, %c0_16], %29 {strides = array<i32>} : memref<1x1x8x128xf32, #tpu.memory_space<vmem>>, vector<1x1x8x128xf32>,
    return
  }
  func.func @transform_0(%arg0: i32, %arg1: i32) -> (i32, i32, i32, i32) {
    %c0_i32 = arith.constant 0 : i32
    %c0_i32_0 = arith.constant 0 : i32
    %c0_i32_1 = arith.constant 0 : i32
    return %arg0, %arg1, %c0_i32, %c0_i32_0 : i32, i32, i32, i32
  }
  func.func @transform_1(%arg0: i32, %arg1: i32) -> (i32, i32) {
    %c0_i32 = arith.constant 0 : i32
    %c0_i32_0 = arith.constant 0 : i32
    %c0_i32_1 = arith.constant 0 : i32
    return %c0_i32, %c0_i32_0 : i32, i32
  }
  func.func @transform_2(%arg0: i32, %arg1: i32) -> (i32, i32, i32, i32) {
    %c0_i32 = arith.constant 0 : i32
    %c0_i32_0 = arith.constant 0 : i32
    %c0_i32_1 = arith.constant 0 : i32
    return %arg0, %arg1, %c0_i32, %c0_i32_0 : i32, i32, i32, i32
  }
  func.func @transform_3(%arg0: i32, %arg1: i32) -> (i32, i32, i32, i32) {
    %c0_i32 = arith.constant 0 : i32
    %c0_i32_0 = arith.constant 0 : i32
    %c0_i32_1 = arith.constant 0 : i32
    return %arg0, %arg1, %c0_i32, %c0_i32_0 : i32, i32, i32, i32
  }
}

</mosaic_0001>

<bundles_post_ra>
// kernel: tpu_custom_call.1
= control target key start
LH: loop header
LB: loop body
LE: loop exit
PB: predicated region body
PF: predicated region fallthrough
CT: control target
= control target key end

     0   :  { %8 = vsyncpa [#allocation3], 0  ;;  %s2394_s0 = inlined_call_operand.hbm [shape: f32[3,8,32,128], index: 0, kind: input, shape index: {}]   ;;  %s2395_s1 = inlined_call_operand.hbm [shape: f32[16,128], index: 1, kind: input, shape index: {}]   ;;  %s2396_s2 = inlined_call_operand.hbm [shape: f32[3,8,16,128], index: 2, kind: input, shape index: {}]   ;;  %s2397_s3 = inlined_call_operand.hbm [shape: f32[3,1,8,128], index: 3, kind: output, shape index: {}]  }
   0x1   :  { %10 = vsyncpa [#allocation3 + $0x1], 0 }
   0x2   :  { %11 = vsyncpa [#allocation6], 0 }
   0x3   :  { %12 = vsyncpa [#allocation4], 0 }
   0x4   :  { %14 = vsyncpa [#allocation4 + $0x1], 0  ;;  %s1866_s12 = smov 0   ;;  %s1868_s13 = smov 0  }
   0x5   :  { %s1870_s14 = smov 0   ;;  %s1872_s15 = smov 0  }
   0x6   :  { %s1874_s16 = smov 0   ;;  %s1876_s17 = smov 0  }
   0x7 LB: > { %s32_s18 = sadd.s32 1, %s1834_s16  ;;  %s41_s19 = sadd.s32 1, %s1826_s14  ;;  %s1838_s17 = sphi %s1876_s17, %s20_s17   ;;  %s1834_s16 = sphi %s1874_s16, %s2427_s16   ;;  %s1830_s15 = sphi %s1872_s15, %s2426_s15   ;;  %s1826_s14 = sphi %s1870_s14, %s2425_s14   ;;  %s1822_s13 = sphi %s1868_s13, %s2424_s13   ;;  %s1818_s12 = sphi %s1866_s12, %s2423_s12  }
   0x8   : > { %p34_p0 = scmp.ge.s32.totalorder %s32_s18, 3  ;;  %p48_p1 = scmp.ne.s32.totalorder %s1826_s14, %s1822_s13 }
   0x9   : > { %p49_p2 = scmp.eq.s32.totalorder %s1838_s17, 0  ;;  %p1558_p5 = scmp.lt.s32.totalorder %s1838_s17, 3 }
   0xa   : > { %s2429_s18 = smov (%p34_p0, %s32_s18), 0  ;;  %s168_s22 = sand.u32 1, %s1838_s17  }
   0xb   : > { %p1906_p3 = por %p49_p2, %p48_p1  ;;  %s36_s21 = ssub.s32 %s1834_s16, %s2429_s18 }
   0xc   : > { %p39_p4 = scmp.eq.s32.totalorder %s36_s21, 0  ;;  %s170_s23 = sand.u32 1, %s1826_s14  }
   0xd   : > { %s1376_s25 = sshll.u32 %s170_s23, 8  ;;  %s1407_s26 = sshll.u32 %s1834_s16, 12 }
   0xe   : > { %s1916_s24 = scalar_select %p39_p4, %s1826_s14, %s41_s19  }
   0xf   : > { %s1922_s29 = scalar_lea.hbm %s2394_s0, %s1407_s26  ;;  %s172_s30 = scalar_lea.vmem [#allocation2], %s1376_s25 }
  0x10   : > { %s182_s4 = sshll.u32 %s172_s30, 4  ;;  %p1928_p6 = pnand %p1558_p5, %p1906_p3  ;;  %s1924_s4 = int_to_ptr.vmem [resolvable:$true] %s182_s4 }
  0x11   : > { %s1932_s6 = sshll.u32 %s170_s23, 7  ;;  %s1934_s7 = scalar_lea.sflag [#allocation3], %s168_s22 }
  0x12   : > { %s1660_s8 = scalar_lea.hbm %s1922_s29, 4096  ;;  %p1662_p8 = pneg %p1928_p6 }
  0x13   : > { %p1661_p7 = scmp.ne.s32.totalorder %s1922_s29, %s1660_s8  ;;  %s1665_s11 = scalar_lea.hbm %s2394_s0, 12288 }
  0x14   : > { %p1666_p11 = scmp.lt.u32.totalorder %s1922_s29, %s2394_s0  ;;  %p1667_p12 = scmp.lt.u32.totalorder %s1665_s11, %s1660_s8 }
  0x15   : > { %p1663_p9 = pnand %p1662_p8, %p1661_p7  ;;  %p1669_p0 = scmp.lt.u32.totalorder %s1660_s8, %s1922_s29 }
  0x16   : > { %p1668_p13 = por %p1667_p12, %p1666_p11 }
  0x17   : > { %p1664_p10 = pneg %p1663_p9 }
  0x18   : > { %p1670_p2 = por %p1669_p0, %p1668_p13 }
  0x1a   : > { %p1671_p3 = pnand %p1670_p2, %p1664_p10 }
  0x1c   : > { %1674 = shalt.err (!%p1671_p3)
}
  0x1d   : > { %s1675_s21 = scalar_lea.vmem %s1924_s4, 4096  ;;  %s1840_s22 = smov [#allocation2]  }
  0x1e   : > { %p1676_p4 = scmp.ne.s32.totalorder %s1924_s4, %s1675_s21  ;;  %s1680_s23 = sshll.u32 %s1840_s22, 4  ;;  %s1681_s23 = int_to_ptr.vmem [resolvable:$false] %s1680_s23 }
  0x1f   : > { %s1682_s25 = scalar_lea.vmem %s1681_s23, 8192  ;;  %p1683_p9 = scmp.lt.s32.totalorder %s1924_s4, %s1681_s23 }
  0x20   : > { %p1678_p5 = pnand %p1676_p4, %p1662_p8  ;;  %p1684_p11 = scmp.lt.s32.totalorder %s1682_s25, %s1675_s21 }
  0x22   : > { %p1679_p7 = pneg %p1678_p5  ;;  %p1685_p12 = por %p1684_p11, %p1683_p9 }
  0x24   : > { %p1686_p13 = pnand %p1685_p12, %p1679_p7 }
  0x26   : > { %1689 = shalt.err (!%p1686_p13)
}
  0x27   : > { %s1841_s26 = smov 128   ;;  %s1842_s27 = smov 8  }
  0x28   : > { %1549 = dma.hbm_to_vmem [thread:$0]  (!%p1928_p6), %s1922_s29, 4096, %s1924_s4, %s1934_s7, %s1841_s26, %s1841_s26, %s1842_s27  }
  0x29   : > { %s196_s28 = scalar_lea.vmem [#allocation7], %s1932_s6  ;;  %s1967_s8 = sadd.s32 4294967295, %s1838_s17  }
  0x2a   : > { %s206_s30 = sshll.u32 %s196_s28, 4  ;;  %s1372_s9 = sadd.s32 4294967294, %s1838_s17   ;;  %s2007_s30 = int_to_ptr.vmem [resolvable:$true] %s206_s30 }
  0x2b   : > { %p54_p10 = scmp.ne.s32.totalorder %s1822_s13, %s1818_s12  ;;  %p2398_p0 = scmp.eq.s32.totalorder %s1967_s8, 0 }
  0x2c   : > { %p129_p2 = scmp.eq.s32.totalorder %s1967_s8, 2  ;;  %p135_p3 = scmp.eq.s32.totalorder %s1372_s9, 2 }
  0x2d   : > { %p1976_p4 = por %p2398_p0, %p54_p10  ;;  %p1373_p5 = scmp.ge.s32.totalorder %s1838_s17, 1 }
  0x2e   : > { %p1984_p7 = por %p129_p2, %p48_p1  ;;  %p1988_p9 = por %p135_p3, %p54_p10 }
  0x2f   : > { %s2406_s10 = scalar_select %p1976_p4, 1, 0 }
  0x30   : > { %s2407_s29 = scalar_select %p1984_p7, 1, 0 }
  0x31   : > { %s2408_s4 = scalar_select %p1988_p9, 1, 0 }
  0x32   : > { %p142_p11 = scmp.lt.s32.totalorder %s1838_s17, 4  ;;  %s1408_s6 = sshll.u32 %s1834_s16, 11 }
  0x33   : > { %s1843_s19 = smov [#allocation5]   ;;  %s2003_s23 = scalar_lea.hbm %s2396_s2, %s1408_s6 }
  0x34   : > { %p1994_p12 = pnand %p1373_p5, %p142_p11  ;;  %s1998_s20 = sshll.u32 %s1843_s19, 4  ;;  %s155_s20 = int_to_ptr.vmem [resolvable:$true] %s1998_s20 }
  0x35   : > { %s1690_s25 = scalar_lea.hbm %s2003_s23, 2048  ;;  %s1695_s19 = scalar_lea.hbm %s2396_s2, 6144 }
  0x36   : > { %s2409_s11 = scalar_select %p1994_p12, 1, 0 }
  0x37   : > { %p1691_p13 = scmp.ne.s32.totalorder %s2003_s23, %s1690_s25  ;;  %p1696_p3 = scmp.lt.u32.totalorder %s2003_s23, %s2396_s2 }
  0x38   : > { %p1697_p5 = scmp.lt.u32.totalorder %s1695_s19, %s1690_s25  ;;  %p1699_p0 = scmp.lt.u32.totalorder %s1690_s25, %s2003_s23 }
  0x39   : > { %p1693_p10 = pnand %p1691_p13, %p1662_p8 }
  0x3a   : > { %p1698_p11 = por %p1697_p5, %p1696_p3 }
  0x3b   : > { %p1694_p2 = pneg %p1693_p10 }
  0x3c   : > { %p1700_p1 = por %p1699_p0, %p1698_p11 }
  0x3e   : > { %p1701_p9 = pnand %p1700_p1, %p1694_p2 }
  0x40   : > { %1704 = shalt.err (!%p1701_p9)
}
  0x41   : > { %s1705_s22 = scalar_lea.vmem %s2007_s30, 2048  ;;  %s1844_s28 = smov [#allocation7]  }
  0x42   : > { %p1706_p13 = scmp.ne.s32.totalorder %s2007_s30, %s1705_s22  ;;  %s1710_s9 = sshll.u32 %s1844_s28, 4  ;;  %s1711_s9 = int_to_ptr.vmem [resolvable:$false] %s1710_s9 }
  0x43   : > { %s1712_s6 = scalar_lea.vmem %s1711_s9, 4096  ;;  %p1713_p4 = scmp.lt.s32.totalorder %s2007_s30, %s1711_s9 }
  0x44   : > { %p1708_p10 = pnand %p1706_p13, %p1662_p8  ;;  %p1714_p3 = scmp.lt.s32.totalorder %s1712_s6, %s1705_s22 }
  0x46   : > { %p1709_p7 = pneg %p1708_p10  ;;  %p1715_p5 = por %p1714_p3, %p1713_p4 }
  0x48   : > { %p1716_p0 = pnand %p1715_p5, %p1709_p7 }
  0x4a   : > { %1719 = shalt.err (!%p1716_p0)
}
  0x4b   : > { %1552 = dma.hbm_to_vmem [thread:$0]  (!%p1928_p6), %s2003_s23, 2048, %s2007_s30, %s1934_s7, %s1841_s26, %s1841_s26, %s1842_s27  }
  0x4c   : > { %p2410_p8 = scmp.eq.s32.totalorder %s1967_s8, 0  ;;  %p2411_p9 = pneg %p1994_p12 }
  0x4d   : > { %s1720_s21 = scalar_lea.hbm %s2395_s1, 256 }
  0x4e   : > { %p2042_p1 = pnand %p2411_p9, %p2410_p8  ;;  %p1721_p4 = scmp.ne.s32.totalorder %s2395_s1, %s1720_s21 }
  0x4f   : > { %p1727_p11 = scmp.lt.u32.totalorder %s1720_s21, %s2395_s1 }
  0x50   : > { %p1722_p7 = pneg %p2042_p1 }
  0x52   : > { %p1723_p6 = pnand %p1722_p7, %p1721_p4 }
  0x54   : > { %p1724_p2 = pneg %p1723_p6 }
  0x56   : > { %p1729_p13 = pnand %p1727_p11, %p1724_p2 }
  0x58   : > { %1732 = shalt.err (!%p1729_p13)
}
  0x59   : > { %s1733_s23 = scalar_lea.vmem %s155_s20, 256  ;;  %p1741_p0 = scmp.lt.s32.totalorder %s155_s20, %s155_s20 }
  0x5a   : > { %p1734_p10 = scmp.ne.s32.totalorder %s155_s20, %s1733_s23  ;;  %p1742_p8 = scmp.lt.s32.totalorder %s1733_s23, %s1733_s23 }
  0x5c   : > { %p1736_p3 = pnand %p1734_p10, %p1722_p7  ;;  %p1743_p9 = por %p1742_p8, %p1741_p0 }
  0x5e   : > { %p1737_p5 = pneg %p1736_p3 }
  0x60   : > { %p1744_p12 = pnand %p1743_p9, %p1737_p5 }
  0x62   : > { %1747 = shalt.err (!%p1744_p12)
}
  0x63   : > { %1545 = dma.hbm_to_vmem [thread:$0]  (!%p2042_p1), %s2395_s1, 256, %s155_s20, [#allocation6], %s1841_s26, %s1841_s26, %s1842_s27  }
  0x64   : > { %p2413_p4 = scmp.ne.s32.totalorder %s2409_s11, 0 }
  0x66   : > { %218 = sbr.rel (%p2413_p4) target bundleno = 644 (0x284), region = 32 }
  0x6d   : > { %s220_s19 = sand.u32 1, %s1967_s8   ;;  %s2069_s5 = sand.u32 1, %s1822_s13  }
  0x6e   : > { %s1383_s21 = sshll.u32 %s2069_s5, 8  ;;  %s221_s22 = scalar_lea.sflag [#allocation3], %s220_s19 }
  0x6f   : > { %s2072_s25 = scalar_lea.vmem [#allocation2], %s1383_s21  ;;  %p2414_p12 = scmp.ne.s32.totalorder %s2406_s10, 0 }
  0x71   : > { %1801 = dma.done.wait (%p2414_p12), %s221_s22, 4096  }
  0x72   : > { %1803 = vsyncadd (%p2414_p12), %s221_s22, 4294963200  ;;  %p2415_p1 = scmp.eq.s32.totalorder %s1967_s8, 0 }
  0x74   : > { %1805 = dma.done.wait (%p2415_p1), [#allocation6], 256   ;;  %p2416_p7 = pmov %p2415_p1 }
  0x75   : > { %s1385_s26 = sshll.u32 %s2069_s5, 7 }
  0x76   : > { %1807 = vsyncadd (%p2416_p7), [#allocation6], 4294967040  ;;  %s2083_s27 = scalar_lea.vmem [#allocation7], %s1385_s26 }
  0x77   : > { %1809 = dma.done.wait (%p2414_p12), %s221_s22, 2048  }
  0x78   : > { %1811 = vsyncadd (%p2414_p12), %s221_s22, 4294965248  ;;  %v300_v0 = vld [vmem:[#allocation5] sm:$0xff]  ;;  %v301_v1 = vld [vmem:[#allocation5 + $0x8] sm:$0xff]  ;;  %vm704_vm0 = vcmask 130048   ;;  %s1386_s8 = sshll.u32 %s2069_s5, 3  ;;  %s1404_s10 = sshll.u32 %s1830_s15, 7 }
  0x79   : > { %v2090_v2 = vld [vmem:[%s2072_s25] sm:$0xff]  ;;  %v518_v3 = vpack.c.bf16 %v301_v1, %v300_v0  ;;  %v2093_v4 = vld [vmem:[%s2072_s25 + $0x8] sm:$0xff]  ;;  %v2098_v6 = vld [vmem:[%s2072_s25 + $0x10] sm:$0xff]  ;;  %s264_s11 = scalar_lea.vmem [#allocation8], %s1386_s8  ;;  %s2346_s30 = scalar_lea.hbm %s2397_s3, %s1404_s10 }
  0x7a   : > { %v502_v5 = vpack.c.bf16 %v2093_v4, %v2090_v2  ;;  %v2101_v7 = vld [vmem:[%s2072_s25 + $0x18] sm:$0xff]  ;;  %v2104_v8 = vld [vmem:[%s2072_s25 + $0x20] sm:$0xff]  ;;  %v2107_v9 = vld [vmem:[%s2072_s25 + $0x28] sm:$0xff]  ;;  %s1256_s20 = sshll.u32 %s264_s11, 4  ;;  %s1242_s23 = scalar_lea.sflag [#allocation4], %s2069_s5  ;;  %s2348_s20 = int_to_ptr.vmem [resolvable:$true] %s1256_s20 }
  0x7b   : > { %1450 = vmatprep.subr.bf16.mxu0 %v518_v3  ;;  %v503_v10 = vpack.c.bf16 %v2101_v7, %v2098_v6  ;;  %v504_v11 = vpack.c.bf16 %v2107_v9, %v2104_v8  ;;  %v2114_v12 = vld [vmem:[%s2072_s25 + $0x30] sm:$0xff]  ;;  %v2117_v13 = vld [vmem:[%s2072_s25 + $0x38] sm:$0xff]  ;;  %v2120_v14 = vld [vmem:[%s2072_s25 + $0x40] sm:$0xff]  ;;  %s1748_s9 = scalar_lea.vmem %s2348_s20, 128  ;;  %p2421_p2 = scmp.ne.s32.totalorder %s2407_s29, 0 }
  0x7c   : > { %1451 = vmatpush3.bf16.xpose.msra.mxu0 %v518_v3  ;;  %1452 = vmatprep.mubr.bf16.mxu0 %v502_v5  ;;  %v2123_v15 = vld [vmem:[%s2072_s25 + $0x48] sm:$0xff]  ;;  %v505_v16 = vpack.c.bf16 %v2117_v13, %v2114_v12  ;;  %v2130_v18 = vld [vmem:[%s2072_s25 + $0x50] sm:$0xff]  ;;  %v2133_v19 = vld [vmem:[%s2072_s25 + $0x58] sm:$0xff]  ;;  %p1749_p6 = scmp.ne.s32.totalorder %s2348_s20, %s1748_s9  ;;  %s1845_s15 = smov [#allocation8]  }
  0x7d   : > { %v506_v17 = vpack.c.bf16 %v2123_v15, %v2120_v14  ;;  %v2136_v20 = vld [vmem:[%s2072_s25 + $0x60] sm:$0xff]  ;;  %v2139_v21 = vld [vmem:[%s2072_s25 + $0x68] sm:$0xff]  ;;  %v507_v22 = vpack.c.bf16 %v2133_v19, %v2130_v18  ;;  %v2146_v24 = vld [vmem:[%s2072_s25 + $0x70] sm:$0xff]  ;;  %s1752_s6 = sshll.u32 %s1845_s15, 4  ;;  %s1753_s6 = int_to_ptr.vmem [resolvable:$false] %s1752_s6 }
  0x7e   : > { %v508_v23 = vpack.c.bf16 %v2139_v21, %v2136_v20  ;;  %v2149_v25 = vld [vmem:[%s2072_s25 + $0x78] sm:$0xff]  ;;  %v2152_v26 = vld [vmem:[%s2072_s25 + $0x80] sm:$0xff]  ;;  %v2155_v27 = vld [vmem:[%s2072_s25 + $0x88] sm:$0xff]  ;;  %p1750_p11 = pnand %p1749_p6, %p2421_p2  ;;  %s1754_s19 = scalar_lea.vmem %s1753_s6, 256 }
  0x7f   : > { %v509_v28 = vpack.c.bf16 %v2149_v25, %v2146_v24  ;;  %v510_v29 = vpack.c.bf16 %v2155_v27, %v2152_v26  ;;  %v2162_v30 = vld [vmem:[%s2072_s25 + $0x90] sm:$0xff]  ;;  %v2165_v31 = vld [vmem:[%s2072_s25 + $0x98] sm:$0xff]  ;;  %v2168_v32 = vld [vmem:[%s2072_s25 + $0xa0] sm:$0xff]  ;;  %p1755_p10 = scmp.lt.s32.totalorder %s2348_s20, %s1753_s6  ;;  %p1756_p3 = scmp.lt.s32.totalorder %s1754_s19, %s1748_s9 }
  0x80   : > { %v2171_v33 = vld [vmem:[%s2072_s25 + $0xa8] sm:$0xff]  ;;  %v302_v34 = vld [vmem:[%s2083_s27] sm:$0xff]  ;;  %v303_v35 = vld [vmem:[%s2083_s27 + $0x8] sm:$0xff]  ;;  %v511_v36 = vpack.c.bf16 %v2165_v31, %v2162_v30  ;;  %p1751_p13 = pneg %p1750_p11 }
  0x81   : > { %v318_v37 = vmax.f32 %v302_v34, %v303_v35  ;;  %v512_v38 = vpack.c.bf16 %v2171_v33, %v2168_v32  ;;  %v2180_v41 = vld [vmem:[%s2072_s25 + $0xb0] sm:$0xff]  ;;  %v2183_v42 = vld [vmem:[%s2072_s25 + $0xb8] sm:$0xff]  ;;  %v2186_v43 = vld [vmem:[%s2072_s25 + $0xc0] sm:$0xff]  ;;  %p1757_p5 = por %p1756_p3, %p1755_p10 }
  0x82   : > { %v2189_v44 = vld [vmem:[%s2072_s25 + $0xc8] sm:$0xff]  ;;  %v304_v46 = vld [vmem:[%s2083_s27 + $0x10] sm:$0xff]  ;;  %v513_v48 = vpack.c.bf16 %v2183_v42, %v2180_v41  ;;  %v2198_v56 = vld [vmem:[%s2072_s25 + $0xd0] sm:$0xff] }
  0x83   : > { %1453 = vmatmul.mubr.bf16.vlgmr.msra.gmra.mrb[0].mxu0 %v503_v10  ;;  %v319_v39 = vrot.slane %v318_v37, 4  ;;  %v305_v47 = vld [vmem:[%s2083_s27 + $0x18] sm:$0xff]  ;;  %v514_v51 = vpack.c.bf16 %v2189_v44, %v2186_v43  ;;  %v2201_v57 = vld [vmem:[%s2072_s25 + $0xd8] sm:$0xff]  ;;  %v2204_v58 = vld [vmem:[%s2072_s25 + $0xe0] sm:$0xff]  ;;  %p1758_p0 = pnand %p1757_p5, %p1751_p13 }
  0x84   : > { %1456 = vmatprep.mubr.bf16.mxu0 %v504_v11  ;;  %v325_v50 = vmax.f32 %v304_v46, %v305_v47  ;;  %v2207_v59 = vld [vmem:[%s2072_s25 + $0xe8] sm:$0xff]  ;;  %v515_v63 = vpack.c.bf16 %v2201_v57, %v2198_v56 }
  0x85   : > { %v320_v40 = vmax.f32 %v318_v37, %v319_v39  ;;  %2417 = vst [vmem:[#allocation13_spill] sm:$0xff] %v2207_v59  ;;  %v516_v5 = vpack.c.bf16 %v2207_v59, %v2204_v58 }
  0x86   : > { %v326_v53 = vrot.slane %v325_v50, 4 }
  0x87   : > { %v321_v45 = vrot.slane %v320_v40, 2 }
  0x88   : > { %v327_v55 = vmax.f32 %v325_v50, %v326_v53 }
  0x89   : > { %v322_v49 = vmax.f32 %v320_v40, %v321_v45 }
  0x8a   : > { %v328_v62 = vrot.slane %v327_v55, 2 }
  0x8b   : > { %1457 = vmatmul.mubr.bf16.gmra.mrb[4].mxu0 %v505_v16  ;;  %v323_v52 = vrot.slane %v322_v49, 1  ;;  %v2214_v16 = vld [vmem:[%s2072_s25 + $0xf0] sm:$0xff] }
  0x8c   : > { %1460 = vmatprep.mubr.bf16.mxu0 %v506_v17  ;;  %v329_v3 = vmax.f32 %v327_v55, %v328_v62  ;;  %v2217_v17 = vld [vmem:[%s2072_s25 + $0xf8] sm:$0xff] }
  0x8d   : > { %v324_v54 = vmax.f32 %v322_v49, %v323_v52  ;;  %2418 = vst [vmem:[#allocation14_spill] sm:$0xff] %v2217_v17 }
  0x8e   : > { %v330_v10 = vrot.slane %v329_v3, 1 }
  0x8f   : > { %v374_v60 = vsub.f32 %v302_v34, %v324_v54  ;;  %v375_v61 = vsub.f32 %v303_v35, %v324_v54 }
  0x90   : > { %v331_v11 = vmax.f32 %v329_v3, %v330_v10 }
  0x91   : > { %v390_v0 = vmul.f32 1.442695, %v374_v60  ;;  %v392_v1 = vmul.f32 1.442695, %v375_v61 }
  0x93   : > { %1461 = vmatmul.mubr.bf16.gmra.mrb[8].mxu0 %v507_v22  ;;  %1612 = vpow2.f32 %v390_v0  ;;  %v376_v22 = vsub.f32 %v304_v46, %v331_v11 }
  0x94   : > { %1464 = vmatprep.mubr.bf16.mxu0 %v508_v23  ;;  %1614 = vpow2.f32 %v392_v1  ;;  %v377_v23 = vsub.f32 %v305_v47, %v331_v11  ;;  %v306_v11 = vld [vmem:[%s2083_s27 + $0x20] sm:$0xff] }
  0x96   : > { %v396_v34 = vmul.f32 1.442695, %v377_v23 }
  0x9b   : > { %1465 = vmatmul.mubr.bf16.gmra.mrb[12].mxu0 %v509_v28  ;;  %v517_v28 = vpack.c.bf16 %v2217_v17, %v2214_v16 }
  0x9c   : > { %1468 = vmatprep.mubr.bf16.mxu0 %v510_v29  ;;  %v394_v29 = vmul.f32 1.442695, %v376_v22  ;;  %v307_v22 = vld [vmem:[%s2083_s27 + $0x28] sm:$0xff] }
  0x9d   : > { %v1613_v35 = vpop.eup %1612  ;;  %v332_v23 = vmax.f32 %v306_v11, %v307_v22 }
  0x9e   : > { %1616 = vpow2.f32 %v394_v29  ;;  %v308_v29 = vld [vmem:[%s2083_s27 + $0x30] sm:$0xff] }
  0x9f   : > { %1618 = vpow2.f32 %v396_v34  ;;  %v309_v34 = vld [vmem:[%s2083_s27 + $0x38] sm:$0xff] }
  0xa3   : > { %1469 = vmatmul.mubr.bf16.gmra.mrb[16].mxu0 %v511_v36  ;;  %v1615_v36 = vpop.eup %1614 }
  0xa4   : > { %1472 = vmatprep.mubr.bf16.mxu0 %v512_v38  ;;  %v422_v37 = vadd.f32 %v1615_v36, %v1613_v35 }
  0xa6   : > { %v423_v38 = vrot.slane %v422_v37, 4 }
  0xa8   : > { %v424_v39 = vadd.f32 %v423_v38, %v422_v37  ;;  %v1617_v40 = vpop.eup %1616 }
  0xaa   : > { %v425_v45 = vrot.slane %v424_v39, 2 }
  0xab   : > { %1473 = vmatmul.mubr.bf16.gmra.mrb[20].mxu0 %v513_v48  ;;  %v1619_v48 = vpop.eup %1618 }
  0xac   : > { %1476 = vmatprep.mubr.bf16.mxu0 %v514_v51  ;;  %v426_v49 = vadd.f32 %v425_v45, %v424_v39  ;;  %v429_v50 = vadd.f32 %v1619_v48, %v1617_v40  ;;  %v310_v39 = vld [vmem:[%s2083_s27 + $0x40] sm:$0xff]  ;;  %v311_v45 = vld [vmem:[%s2083_s27 + $0x48] sm:$0xff] }
  0xae   : > { %v427_v46 = vrot.slane %v426_v49, 1  ;;  %v430_v47 = vrot.slane %v429_v50, 4 }
  0xb0   : > { %v428_v51 = vadd.f32 %v427_v46, %v426_v49  ;;  %v431_v52 = vadd.f32 %v430_v47, %v429_v50 }
  0xb2   : > { %1620 = vrcp.f32 %v428_v51  ;;  %v432_v53 = vrot.slane %v431_v52, 2  ;;  %v312_v51 = vld [vmem:[%s2083_s27 + $0x50] sm:$0xff] }
  0xb3   : > { %1477 = vmatmul.mubr.bf16.gmra.mrb[24].mxu0 %v515_v63 }
  0xb4   : > { %1480 = vmatprep.mubr.bf16.mxu0 %v516_v5  ;;  %v433_v54 = vadd.f32 %v432_v53, %v431_v52  ;;  %v313_v52 = vld [vmem:[%s2083_s27 + $0x58] sm:$0xff] }
  0xb6   : > { %v434_v55 = vrot.slane %v433_v54, 1 }
  0xb8   : > { %v435_v60 = vadd.f32 %v434_v55, %v433_v54 }
  0xba   : > { %1622 = vrcp.f32 %v435_v60  ;;  %v353_v60 = vmax.f32 %v312_v51, %v313_v52 }
  0xbb   : > { %1481 = vmatmul.mubr.bf16.gmra.mrb[28].mxu0 %v517_v28  ;;  %v333_v28 = vrot.slane %v332_v23, 4 }
  0xbc   : > { %v1621_v61 = vpop.eup %1620 }
  0xbd   : > { %v486_v62 = vmul.f32 %v1621_v61, %v1613_v35  ;;  %v487_v63 = vmul.f32 %v1621_v61, %v1615_v36  ;;  %v339_v35 = vmax.f32 %v308_v29, %v309_v34  ;;  %v334_v36 = vmax.f32 %v332_v23, %v333_v28 }
  0xbf   : > { %v696_v0 = vpack.c.bf16 %v487_v63, %v486_v62  ;;  %v340_v37 = vrot.slane %v339_v35, 4  ;;  %v335_v38 = vrot.slane %v334_v36, 2 }
  0xc1   : > { %1484 = vmatprep.subr.bf16.mxu1 %v696_v0  ;;  %v336_v49 = vmax.f32 %v334_v36, %v335_v38 }
  0xc2   : > { %1485 = vmatpush3.bf16.msra.mxu1 %v696_v0  ;;  %v354_v0 = vrot.slane %v353_v60, 4 }
  0xc3   : > { %v337_v47 = vrot.slane %v336_v49, 1 }
  0xc4   : > { %v1623_v1 = vpop.eup %1622  ;;  %v355_v36 = vmax.f32 %v353_v60, %v354_v0 }
  0xc5   : > { %v488_v3 = vmul.f32 %v1623_v1, %v1617_v40  ;;  %v489_v5 = vmul.f32 %v1623_v1, %v1619_v48  ;;  %v341_v40 = vmax.f32 %v339_v35, %v340_v37  ;;  %v346_v48 = vmax.f32 %v310_v39, %v311_v45 }
  0xc6   : > { %v338_v55 = vmax.f32 %v336_v49, %v337_v47  ;;  %v356_v49 = vrot.slane %v355_v36, 2 }
  0xc7   : > { %v2221_v10 = vpack.c.bf16 %v489_v5, %v488_v3  ;;  %v342_v50 = vrot.slane %v341_v40, 2  ;;  %v347_v46 = vrot.slane %v346_v48, 4  ;;  %v314_v3 = vld [vmem:[%s2083_s27 + $0x60] sm:$0xff]  ;;  %v2234_v5 = vld [vmem:[%s2083_s27 + $0x68] sm:$0xff] }
  0xc8   : > { %v378_v63 = vsub.f32 %v306_v11, %v338_v55  ;;  %v379_v1 = vsub.f32 %v307_v22, %v338_v55  ;;  %v360_v37 = vmax.f32 %v314_v3, %v2234_v5  ;;  %v316_v22 = vld [vmem:[%s2083_s27 + $0x70] sm:$0xff]  ;;  %v357_v17 = vmax.f32 %v355_v36, %v356_v49 }
  0xc9   : > { %1490 = vmatprep.subr.bf16.mxu1 %v2221_v10  ;;  %v343_v53 = vmax.f32 %v341_v40, %v342_v50  ;;  %v348_v54 = vmax.f32 %v346_v48, %v347_v46  ;;  %v2239_v46 = vld [vmem:[%s2083_s27 + $0x78] sm:$0xff] }
  0xca   : > { %v398_v35 = vmul.f32 1.442695, %v378_v63  ;;  %v400_v38 = vmul.f32 1.442695, %v379_v1  ;;  %v361_v50 = vrot.slane %v360_v37, 4 }
  0xcb   : > { %v344_v61 = vrot.slane %v343_v53, 1  ;;  %v349_v62 = vrot.slane %v348_v54, 2 }
  0xcc   : > { %1624 = vpow2.f32 %v398_v35 }
  0xcd   : > { %v345_v23 = vmax.f32 %v343_v53, %v344_v61  ;;  %v350_v28 = vmax.f32 %v348_v54, %v349_v62  ;;  %1626 = vpow2.f32 %v400_v38  ;;  %v362_v53 = vmax.f32 %v360_v37, %v361_v50 }
  0xce   : > { %v367_v54 = vmax.f32 %v316_v22, %v2239_v46 }
  0xcf   : > { %v380_v40 = vsub.f32 %v308_v29, %v345_v23  ;;  %v351_v48 = vrot.slane %v350_v28, 1  ;;  %v381_v11 = vsub.f32 %v309_v34, %v345_v23  ;;  %v358_v29 = vrot.slane %v357_v17, 1 }
  0xd0   : > { %v363_v63 = vrot.slane %v362_v53, 2  ;;  %v368_v0 = vrot.slane %v367_v54, 4 }
  0xd1   : > { %v402_v47 = vmul.f32 1.442695, %v380_v40  ;;  %v352_v55 = vmax.f32 %v350_v28, %v351_v48  ;;  %v404_v60 = vmul.f32 1.442695, %v381_v11  ;;  %v359_v38 = vmax.f32 %v357_v17, %v358_v29 }
  0xd2   : > { %v364_v28 = vmax.f32 %v362_v53, %v363_v63  ;;  %v369_v36 = vmax.f32 %v367_v54, %v368_v0 }
  0xd3   : > { %1628 = vpow2.f32 %v402_v47  ;;  %v382_v61 = vsub.f32 %v310_v39, %v352_v55  ;;  %v383_v62 = vsub.f32 %v311_v45, %v352_v55  ;;  %v384_v39 = vsub.f32 %v312_v51, %v359_v38 }
  0xd4   : > { %1630 = vpow2.f32 %v404_v60  ;;  %v365_v45 = vrot.slane %v364_v28, 1  ;;  %v370_v40 = vrot.slane %v369_v36, 2  ;;  %v385_v49 = vsub.f32 %v313_v52, %v359_v38 }
  0xd5   : > { %v406_v23 = vmul.f32 1.442695, %v382_v61  ;;  %v408_v35 = vmul.f32 1.442695, %v383_v62  ;;  %v410_v47 = vmul.f32 1.442695, %v384_v39 }
  0xd6   : > { %v2242_v1 = vpop.eup %1624  ;;  %v366_v55 = vmax.f32 %v364_v28, %v365_v45  ;;  %v371_v60 = vmax.f32 %v369_v36, %v370_v40  ;;  %v412_v17 = vmul.f32 1.442695, %v385_v49 }
  0xd7   : > { %v2244_v34 = vpop.eup %1626  ;;  %1632 = vpow2.f32 %v406_v23 }
  0xd8   : > { %v436_v37 = vadd.f32 %v2244_v34, %v2242_v1  ;;  %1634 = vpow2.f32 %v408_v35  ;;  %v386_v61 = vsub.f32 %v314_v3, %v366_v55  ;;  %v372_v62 = vrot.slane %v371_v60, 1 }
  0xd9   : > { %1636 = vpow2.f32 %v410_v47  ;;  %v387_v29 = vsub.f32 %v2234_v5, %v366_v55 }
  0xda   : > { %v437_v50 = vrot.slane %v436_v37, 4  ;;  %1638 = vpow2.f32 %v412_v17  ;;  %v414_v23 = vmul.f32 1.442695, %v386_v61  ;;  %v373_v35 = vmax.f32 %v371_v60, %v372_v62 }
  0xdb   : > { %v416_v28 = vmul.f32 1.442695, %v387_v29 }
  0xdc   : > { %v438_v53 = vadd.f32 %v437_v50, %v436_v37  ;;  %1640 = vpow2.f32 %v414_v23  ;;  %v388_v3 = vsub.f32 %v316_v22, %v373_v35  ;;  %v389_v45 = vsub.f32 %v2239_v46, %v373_v35 }
  0xdd   : > { %v2248_v48 = vpop.eup %1628  ;;  %1642 = vpow2.f32 %v416_v28 }
  0xde   : > { %v2250_v11 = vpop.eup %1630  ;;  %v439_v63 = vrot.slane %v438_v53, 2  ;;  %v418_v47 = vmul.f32 1.442695, %v388_v3  ;;  %v420_v60 = vmul.f32 1.442695, %v389_v45 }
  0xdf   : > { %v443_v54 = vadd.f32 %v2250_v11, %v2248_v48 }
  0xe0   : > { %v440_v36 = vadd.f32 %v439_v63, %v438_v53  ;;  %1644 = vpow2.f32 %v418_v47 }
  0xe1   : > { %v2254_v51 = vpop.eup %1632  ;;  %v444_v0 = vrot.slane %v443_v54, 4  ;;  %1646 = vpow2.f32 %v420_v60 }
  0xe2   : > { %v2257_v52 = vpop.eup %1634  ;;  %v441_v5 = vrot.slane %v440_v36, 1 }
  0xe3   : > { %v450_v38 = vadd.f32 %v2257_v52, %v2254_v51  ;;  %v445_v37 = vadd.f32 %v444_v0, %v443_v54  ;;  %v2262_v40 = vpop.eup %1636 }
  0xe4   : > { %v2264_v50 = vpop.eup %1638  ;;  %v442_v17 = vadd.f32 %v441_v5, %v440_v36 }
  0xe5   : > { %v451_v39 = vrot.slane %v450_v38, 4  ;;  %v446_v49 = vrot.slane %v445_v37, 2  ;;  %v457_v53 = vadd.f32 %v2264_v50, %v2262_v40 }
  0xe6   : > { %v2268_v54 = vpop.eup %1640  ;;  %1648 = vrcp.f32 %v442_v17 }
  0xe7   : > { %v452_v55 = vadd.f32 %v451_v39, %v450_v38  ;;  %v447_v61 = vadd.f32 %v446_v49, %v445_v37  ;;  %v458_v62 = vrot.slane %v457_v53, 4  ;;  %v2270_v29 = vpop.eup %1642 }
  0xe8   : > { %v464_v35 = vadd.f32 %v2270_v29, %v2268_v54 }
  0xe9   : > { %v453_v22 = vrot.slane %v452_v55, 2  ;;  %v448_v46 = vrot.slane %v447_v61, 1  ;;  %v459_v23 = vadd.f32 %v458_v62, %v457_v53 }
  0xea   : > { %v2274_v28 = vpop.eup %1644  ;;  %v465_v37 = vrot.slane %v464_v35, 4 }
  0xeb   : > { %v454_v63 = vadd.f32 %v453_v22, %v452_v55  ;;  %v449_v0 = vadd.f32 %v448_v46, %v447_v61  ;;  %v460_v36 = vrot.slane %v459_v23, 2  ;;  %v2276_v3 = vpop.eup %1646 }
  0xec   : > { %v466_v47 = vadd.f32 %v465_v37, %v464_v35  ;;  %v471_v55 = vadd.f32 %v2276_v3, %v2274_v28 }
  0xed   : > { %v455_v38 = vrot.slane %v454_v63, 1  ;;  %1650 = vrcp.f32 %v449_v0  ;;  %v461_v49 = vadd.f32 %v460_v36, %v459_v23 }
  0xee   : > { %v467_v59 = vrot.slane %v466_v47, 2 }
  0xef   : > { %v456_v45 = vadd.f32 %v455_v38, %v454_v63  ;;  %v462_v0 = vrot.slane %v461_v49, 1  ;;  %v472_v63 = vrot.slane %v471_v55, 4 }
  0xf0   : > { %v1649_v39 = vpop.eup %1648 }
  0xf1   : > { %v490_v17 = vmul.f32 %v1649_v39, %v2242_v1  ;;  %v491_v61 = vmul.f32 %v1649_v39, %v2244_v34  ;;  %1652 = vrcp.f32 %v456_v45  ;;  %v463_v35 = vadd.f32 %v462_v0, %v461_v49 }
  0xf2   : > { %v468_v34 = vadd.f32 %v467_v59, %v466_v47  ;;  %v473_v36 = vadd.f32 %v472_v63, %v471_v55 }
  0xf3   : > { %v698_v38 = vpack.c.bf16 %v491_v61, %v490_v17  ;;  %1654 = vrcp.f32 %v463_v35 }
  0xf7   : > { %v1651_v23 = vpop.eup %1650 }
  0xf8   : > { %v492_v39 = vmul.f32 %v1651_v23, %v2248_v48  ;;  %v493_v45 = vmul.f32 %v1651_v23, %v2250_v11 }
 0x156   : > { %v1454_v5 = vpop.f32.mrb[0].mxu0 }
 0x157   : > { %v553_v60 = vpop.f32.mrb[1].mxu0 }
 0x158   : > { %v1455_v53 = vpop.f32.mrb[2].mxu0 }
 0x159   : > { %v681_v22 = vpack.c.bf16 %v1455_v53, %v1454_v5  ;;  %v556_v46 = vpop.f32.mrb[3].mxu0  ;;  %v469_v53 = vrot.slane %v468_v34, 1 }
 0x15a   : > { %v680_v62 = vpack.c.bf16 %v556_v46, %v553_v60  ;;  %v474_v46 = vrot.slane %v473_v36, 2 }
 0x15c   : > { %1486 = vmatprep.mubr.msk.bf16.mxu1 %vm704_vm0, %v680_v62  ;;  %v699_v62 = vpack.c.bf16 %v493_v45, %v492_v39  ;;  %v475_v49 = vadd.f32 %v474_v46, %v473_v36 }
 0x15d   : > { %1487 = vmatmul.mubr.msk.bf16.vlgmr.msra.gmra.mrb[0].mxu1 %vm704_vm0, %v681_v22  ;;  %v1653_v22 = vpop.eup %1652 }
 0x15e   : > { %1491 = vmatpush3.bf16.msra.mxu1 %v2221_v10  ;;  %v1458_v1 = vpop.f32.mrb[4].mxu0  ;;  %v470_v10 = vadd.f32 %v469_v53, %v468_v34  ;;  %v494_v11 = vmul.f32 %v1653_v22, %v2254_v51  ;;  %v495_v47 = vmul.f32 %v1653_v22, %v2257_v52 }
 0x15f   : > { %v569_v37 = vpop.f32.mrb[5].mxu0  ;;  %1496 = vmatprep.subr.bf16.mxu1 %v698_v38 }
 0x160   : > { %v1459_v5 = vpop.f32.mrb[6].mxu0  ;;  %1656 = vrcp.f32 %v470_v10  ;;  %v700_v35 = vpack.c.bf16 %v495_v47, %v494_v11 }
 0x161   : > { %v683_v60 = vpack.c.bf16 %v1459_v5, %v1458_v1  ;;  %v572_v17 = vpop.f32.mrb[7].mxu0  ;;  %v476_v1 = vrot.slane %v475_v49, 1 }
 0x162   : > { %v682_v61 = vpack.c.bf16 %v572_v17, %v569_v37  ;;  %v1655_v37 = vpop.eup %1654 }
 0x163   : > { %v477_v34 = vadd.f32 %v476_v1, %v475_v49  ;;  %v496_v51 = vmul.f32 %v1655_v37, %v2262_v40  ;;  %v497_v52 = vmul.f32 %v1655_v37, %v2264_v50 }
 0x164   : > { %1492 = vmatprep.mubr.msk.bf16.mxu1 %vm704_vm0, %v682_v61 }
 0x165   : > { %1493 = vmatmul.mubr.msk.bf16.vlgmr.msra.gmra.mrb[4].mxu1 %vm704_vm0, %v683_v60  ;;  %1658 = vrcp.f32 %v477_v34  ;;  %v701_v17 = vpack.c.bf16 %v497_v52, %v496_v51 }
 0x166   : > { %1497 = vmatpush3.bf16.msra.mxu1 %v698_v38  ;;  %v1462_v59 = vpop.f32.mrb[8].mxu0 }
 0x167   : > { %v585_v48 = vpop.f32.mrb[9].mxu0  ;;  %1502 = vmatprep.subr.bf16.mxu1 %v699_v62 }
 0x168   : > { %v1463_v55 = vpop.f32.mrb[10].mxu0 }
 0x169   : > { %v685_v0 = vpack.c.bf16 %v1463_v55, %v1462_v59  ;;  %v588_v63 = vpop.f32.mrb[11].mxu0 }
 0x16a   : > { %v684_v23 = vpack.c.bf16 %v588_v63, %v585_v48  ;;  %v1657_v61 = vpop.eup %1656 }
 0x16b   : > { %v498_v22 = vmul.f32 %v1657_v61, %v2268_v54  ;;  %v499_v40 = vmul.f32 %v1657_v61, %v2270_v29 }
 0x16c   : > { %1498 = vmatprep.mubr.msk.bf16.mxu1 %vm704_vm0, %v684_v23 }
 0x16d   : > { %1499 = vmatmul.mubr.msk.bf16.vlgmr.msra.gmra.mrb[8].mxu1 %vm704_vm0, %v685_v0  ;;  %v702_v49 = vpack.c.bf16 %v499_v40, %v498_v22 }
 0x16e   : > { %1503 = vmatpush3.bf16.msra.mxu1 %v699_v62  ;;  %v1466_v38 = vpop.f32.mrb[12].mxu0 }
 0x16f   : > { %v601_v36 = vpop.f32.mrb[13].mxu0  ;;  %1508 = vmatprep.subr.bf16.mxu1 %v700_v35  ;;  %v1659_v48 = vpop.eup %1658 }
 0x170   : > { %v1467_v39 = vpop.f32.mrb[14].mxu0  ;;  %v500_v55 = vmul.f32 %v1659_v48, %v2274_v28  ;;  %v501_v54 = vmul.f32 %v1659_v48, %v2276_v3 }
 0x171   : > { %v687_v45 = vpack.c.bf16 %v1467_v39, %v1466_v38  ;;  %v604_v5 = vpop.f32.mrb[15].mxu0 }
 0x172   : > { %v686_v60 = vpack.c.bf16 %v604_v5, %v601_v36  ;;  %v703_v1 = vpack.c.bf16 %v501_v54, %v500_v55 }
 0x174   : > { %1504 = vmatprep.mubr.msk.bf16.mxu1 %vm704_vm0, %v686_v60 }
 0x175   : > { %1505 = vmatmul.mubr.msk.bf16.vlgmr.msra.gmra.mrb[12].mxu1 %vm704_vm0, %v687_v45 }
 0x176   : > { %1509 = vmatpush3.bf16.msra.mxu1 %v700_v35  ;;  %v1470_v53 = vpop.f32.mrb[16].mxu0 }
 0x177   : > { %v617_v46 = vpop.f32.mrb[17].mxu0  ;;  %1514 = vmatprep.subr.bf16.mxu1 %v701_v17 }
 0x178   : > { %v1471_v50 = vpop.f32.mrb[18].mxu0 }
 0x179   : > { %v689_v62 = vpack.c.bf16 %v1471_v50, %v1470_v53  ;;  %v620_v59 = vpop.f32.mrb[19].mxu0 }
 0x17a   : > { %v688_v10 = vpack.c.bf16 %v620_v59, %v617_v46 }
 0x17c   : > { %1510 = vmatprep.mubr.msk.bf16.mxu1 %vm704_vm0, %v688_v10 }
 0x17d   : > { %1511 = vmatmul.mubr.msk.bf16.vlgmr.msra.gmra.mrb[16].mxu1 %vm704_vm0, %v689_v62 }
 0x17e   : > { %1515 = vmatpush3.bf16.msra.mxu1 %v701_v17  ;;  %v1474_v11 = vpop.f32.mrb[20].mxu0 }
 0x17f   : > { %v633_v47 = vpop.f32.mrb[21].mxu0  ;;  %1520 = vmatprep.subr.bf16.mxu1 %v702_v49 }
 0x180   : > { %v1475_v0 = vpop.f32.mrb[22].mxu0 }
 0x181   : > { %v691_v29 = vpack.c.bf16 %v1475_v0, %v1474_v11  ;;  %v636_v63 = vpop.f32.mrb[23].mxu0 }
 0x182   : > { %v690_v23 = vpack.c.bf16 %v636_v63, %v633_v47 }
 0x184   : > { %1516 = vmatprep.mubr.msk.bf16.mxu1 %vm704_vm0, %v690_v23 }
 0x185   : > { %1517 = vmatmul.mubr.msk.bf16.vlgmr.msra.gmra.mrb[20].mxu1 %vm704_vm0, %v691_v29 }
 0x186   : > { %1521 = vmatpush3.bf16.msra.mxu1 %v702_v49  ;;  %v1478_v35 = vpop.f32.mrb[24].mxu0 }
 0x187   : > { %v649_v37 = vpop.f32.mrb[25].mxu0  ;;  %1526 = vmatprep.subr.bf16.mxu1 %v703_v1 }
 0x188   : > { %v1479_v38 = vpop.f32.mrb[26].mxu0 }
 0x189   : > { %v693_v34 = vpack.c.bf16 %v1479_v38, %v1478_v35  ;;  %v652_v36 = vpop.f32.mrb[27].mxu0 }
 0x18a   : > { %v692_v51 = vpack.c.bf16 %v652_v36, %v649_v37 }
 0x18c   : > { %1522 = vmatprep.mubr.msk.bf16.mxu1 %vm704_vm0, %v692_v51 }
 0x18d   : > { %1523 = vmatmul.mubr.msk.bf16.vlgmr.msra.gmra.mrb[24].mxu1 %vm704_vm0, %v693_v34 }
 0x18e   : > { %1527 = vmatpush3.bf16.msra.mxu1 %v703_v1  ;;  %v1482_v28 = vpop.f32.mrb[28].mxu0 }
 0x18f   : > { %v665_v3 = vpop.f32.mrb[29].mxu0 }
 0x190   : > { %v1483_v52 = vpop.f32.mrb[30].mxu0 }
 0x191   : > { %v695_v39 = vpack.c.bf16 %v1483_v52, %v1482_v28  ;;  %v668_v45 = vpop.f32.mrb[31].mxu0 }
 0x192   : > { %v694_v5 = vpack.c.bf16 %v668_v45, %v665_v3 }
 0x194   : > { %1528 = vmatprep.mubr.msk.bf16.mxu1 %vm704_vm0, %v694_v5 }
 0x195   : > { %1529 = vmatmul.mubr.msk.bf16.vlgmr.msra.gmra.mrb[28].mxu1 %vm704_vm0, %v695_v39 }
 0x230   : > { %v1488_v60 = vpop.f32.mrb[0].mxu1 }
 0x231   : > { %v745_v17 = vpop.f32.mrb[1].mxu1  ;;  %v1147_v22 = vsub.f32 %v2098_v6, %v1488_v60 }
 0x232   : > { %v1145_v61 = vsub.f32 %v2090_v2, %v745_v17  ;;  %v1489_v53 = vpop.f32.mrb[2].mxu1 }
 0x233   : > { %v748_v46 = vpop.f32.mrb[3].mxu1  ;;  %v1148_v62 = vsub.f32 %v2101_v7, %v1489_v53  ;;  %v1179_v10 = vmul.f32 %v1147_v22, %v1147_v22 }
 0x234   : > { %v1146_v40 = vsub.f32 %v2093_v4, %v748_v46  ;;  %v1177_v50 = vmul.f32 %v1145_v61, %v1145_v61 }
 0x235   : > { %v1180_v47 = vmul.f32 %v1148_v62, %v1148_v62 }
 0x236   : > { %v1178_v59 = vmul.f32 %v1146_v40, %v1146_v40 }
 0x238   : > { %v1209_v49 = vadd.f32 %v1178_v59, %v1177_v50  ;;  %v1494_v48 = vpop.f32.mrb[4].mxu1 }
 0x239   : > { %v800_v11 = vpop.f32.mrb[5].mxu1  ;;  %v1151_v29 = vsub.f32 %v2114_v12, %v1494_v48 }
 0x23a   : > { %v1210_v55 = vadd.f32 %v1209_v49, %v1179_v10  ;;  %v1149_v54 = vsub.f32 %v2104_v8, %v800_v11  ;;  %v1495_v0 = vpop.f32.mrb[6].mxu1 }
 0x23b   : > { %v803_v2 = vpop.f32.mrb[7].mxu1  ;;  %v1152_v7 = vsub.f32 %v2117_v13, %v1495_v0  ;;  %v1183_v35 = vmul.f32 %v1151_v29, %v1151_v29 }
 0x23c   : > { %v1181_v63 = vmul.f32 %v1149_v54, %v1149_v54  ;;  %v1211_v6 = vadd.f32 %v1210_v55, %v1180_v47  ;;  %v1150_v4 = vsub.f32 %v2107_v9, %v803_v2 }
 0x23d   : > { %v1184_v36 = vmul.f32 %v1152_v7, %v1152_v7 }
 0x23e   : > { %v1212_v23 = vadd.f32 %v1211_v6, %v1181_v63  ;;  %v1182_v1 = vmul.f32 %v1150_v4, %v1150_v4 }
 0x240   : > { %v1213_v37 = vadd.f32 %v1212_v23, %v1182_v1  ;;  %v1500_v38 = vpop.f32.mrb[8].mxu1 }
 0x241   : > { %v855_v34 = vpop.f32.mrb[9].mxu1  ;;  %v1155_v12 = vsub.f32 %v2130_v18, %v1500_v38 }
 0x242   : > { %v1214_v51 = vadd.f32 %v1213_v37, %v1183_v35  ;;  %v1153_v8 = vsub.f32 %v2120_v14, %v855_v34  ;;  %v1501_v28 = vpop.f32.mrb[10].mxu1 }
 0x243   : > { %v858_v3 = vpop.f32.mrb[11].mxu1  ;;  %v1156_v13 = vsub.f32 %v2133_v19, %v1501_v28  ;;  %v1187_v60 = vmul.f32 %v1155_v12, %v1155_v12 }
 0x244   : > { %v1185_v52 = vmul.f32 %v1153_v8, %v1153_v8  ;;  %v1215_v39 = vadd.f32 %v1214_v51, %v1184_v36  ;;  %v1154_v9 = vsub.f32 %v2123_v15, %v858_v3 }
 0x245   : > { %v1188_v46 = vmul.f32 %v1156_v13, %v1156_v13 }
 0x246   : > { %v1216_v45 = vadd.f32 %v1215_v39, %v1185_v52  ;;  %v1186_v5 = vmul.f32 %v1154_v9, %v1154_v9 }
 0x248   : > { %v1217_v17 = vadd.f32 %v1216_v45, %v1186_v5  ;;  %v1506_v61 = vpop.f32.mrb[12].mxu1 }
 0x249   : > { %v910_v53 = vpop.f32.mrb[13].mxu1  ;;  %v1159_v18 = vsub.f32 %v2146_v24, %v1506_v61 }
 0x24a   : > { %v1218_v22 = vadd.f32 %v1217_v17, %v1187_v60  ;;  %v1157_v14 = vsub.f32 %v2136_v20, %v910_v53  ;;  %v1507_v40 = vpop.f32.mrb[14].mxu1 }
 0x24b   : > { %v913_v50 = vpop.f32.mrb[15].mxu1  ;;  %v1160_v19 = vsub.f32 %v2149_v25, %v1507_v40  ;;  %v1191_v48 = vmul.f32 %v1159_v18, %v1159_v18 }
 0x24c   : > { %v1189_v62 = vmul.f32 %v1157_v14, %v1157_v14  ;;  %v1219_v59 = vadd.f32 %v1218_v22, %v1188_v46  ;;  %v1158_v15 = vsub.f32 %v2139_v21, %v913_v50 }
 0x24d   : > { %v1192_v54 = vmul.f32 %v1160_v19, %v1160_v19 }
 0x24e   : > { %v1220_v10 = vadd.f32 %v1219_v59, %v1189_v62  ;;  %v1190_v49 = vmul.f32 %v1158_v15, %v1158_v15 }
 0x250   : > { %v1221_v11 = vadd.f32 %v1220_v10, %v1190_v49  ;;  %v1512_v47 = vpop.f32.mrb[16].mxu1  ;;  %v2419_v49 = vld [vmem:[#allocation13_spill] sm:$0xff] }
 0x251   : > { %v965_v55 = vpop.f32.mrb[17].mxu1  ;;  %v1163_v24 = vsub.f32 %v2162_v30, %v1512_v47 }
 0x252   : > { %v1222_v0 = vadd.f32 %v1221_v11, %v1191_v48  ;;  %v1161_v20 = vsub.f32 %v2152_v26, %v965_v55  ;;  %v1513_v2 = vpop.f32.mrb[18].mxu1  ;;  %v2420_v11 = vld [vmem:[#allocation14_spill] sm:$0xff] }
 0x253   : > { %v968_v29 = vpop.f32.mrb[19].mxu1  ;;  %v1164_v25 = vsub.f32 %v2165_v31, %v1513_v2  ;;  %v1195_v7 = vmul.f32 %v1163_v24, %v1163_v24 }
 0x254   : > { %v1193_v63 = vmul.f32 %v1161_v20, %v1161_v20  ;;  %v1223_v6 = vadd.f32 %v1222_v0, %v1192_v54  ;;  %v1162_v21 = vsub.f32 %v2155_v27, %v968_v29 }
 0x255   : > { %v1196_v38 = vmul.f32 %v1164_v25, %v1164_v25 }
 0x256   : > { %v1224_v4 = vadd.f32 %v1223_v6, %v1193_v63  ;;  %v1194_v23 = vmul.f32 %v1162_v21, %v1162_v21 }
 0x258   : > { %v1225_v1 = vadd.f32 %v1224_v4, %v1194_v23  ;;  %v1518_v35 = vpop.f32.mrb[20].mxu1 }
 0x259   : > { %v1020_v37 = vpop.f32.mrb[21].mxu1  ;;  %v1167_v30 = vsub.f32 %v2180_v41, %v1518_v35 }
 0x25a   : > { %v1226_v34 = vadd.f32 %v1225_v1, %v1195_v7  ;;  %v1165_v26 = vsub.f32 %v2168_v32, %v1020_v37  ;;  %v1519_v36 = vpop.f32.mrb[22].mxu1 }
 0x25b   : > { %v1023_v51 = vpop.f32.mrb[23].mxu1  ;;  %v1168_v31 = vsub.f32 %v2183_v42, %v1519_v36  ;;  %v1199_v52 = vmul.f32 %v1167_v30, %v1167_v30 }
 0x25c   : > { %v1197_v8 = vmul.f32 %v1165_v26, %v1165_v26  ;;  %v1227_v28 = vadd.f32 %v1226_v34, %v1196_v38  ;;  %v1166_v27 = vsub.f32 %v2171_v33, %v1023_v51 }
 0x25d   : > { %v1200_v13 = vmul.f32 %v1168_v31, %v1168_v31 }
 0x25e   : > { %v1228_v3 = vadd.f32 %v1227_v28, %v1197_v8  ;;  %v1198_v12 = vmul.f32 %v1166_v27, %v1166_v27 }
 0x260   : > { %v1229_v39 = vadd.f32 %v1228_v3, %v1198_v12  ;;  %v1524_v9 = vpop.f32.mrb[24].mxu1 }
 0x261   : > { %v1075_v45 = vpop.f32.mrb[25].mxu1  ;;  %v1171_v41 = vsub.f32 %v2198_v56, %v1524_v9 }
 0x262   : > { %v1230_v5 = vadd.f32 %v1229_v39, %v1199_v52  ;;  %v1169_v32 = vsub.f32 %v2186_v43, %v1075_v45  ;;  %v1525_v60 = vpop.f32.mrb[26].mxu1 }
 0x263   : > { %v1078_v17 = vpop.f32.mrb[27].mxu1  ;;  %v1172_v42 = vsub.f32 %v2201_v57, %v1525_v60  ;;  %v1203_v14 = vmul.f32 %v1171_v41, %v1171_v41 }
 0x264   : > { %v1201_v61 = vmul.f32 %v1169_v32, %v1169_v32  ;;  %v1231_v53 = vadd.f32 %v1230_v5, %v1200_v13  ;;  %v1170_v33 = vsub.f32 %v2189_v44, %v1078_v17 }
 0x265   : > { %v1204_v62 = vmul.f32 %v1172_v42, %v1172_v42 }
 0x266   : > { %v1232_v46 = vadd.f32 %v1231_v53, %v1201_v61  ;;  %v1202_v22 = vmul.f32 %v1170_v33, %v1170_v33 }
 0x268   : > { %v1233_v40 = vadd.f32 %v1232_v46, %v1202_v22  ;;  %v1530_v50 = vpop.f32.mrb[28].mxu1 }
 0x269   : > { %v1130_v18 = vpop.f32.mrb[29].mxu1  ;;  %v1175_v10 = vsub.f32 %v2214_v16, %v1530_v50 }
 0x26a   : > { %v1234_v43 = vadd.f32 %v1233_v40, %v1203_v14  ;;  %v1173_v59 = vsub.f32 %v2204_v58, %v1130_v18  ;;  %v1531_v15 = vpop.f32.mrb[30].mxu1 }
 0x26b   : > { %v1133_v56 = vpop.f32.mrb[31].mxu1  ;;  %v1176_v47 = vsub.f32 %v2420_v11, %v1531_v15  ;;  %v1207_v54 = vmul.f32 %v1175_v10, %v1175_v10 }
 0x26c   : > { %v1205_v19 = vmul.f32 %v1173_v59, %v1173_v59  ;;  %v1235_v44 = vadd.f32 %v1234_v43, %v1204_v62  ;;  %v1174_v57 = vsub.f32 %v2419_v49, %v1133_v56 }
 0x26d   : > { %v1208_v58 = vmul.f32 %v1176_v47, %v1176_v47 }
 0x26e   : > { %v1236_v48 = vadd.f32 %v1235_v44, %v1205_v19  ;;  %v1206_v55 = vmul.f32 %v1174_v57, %v1174_v57 }
 0x270   : > { %v1237_v0 = vadd.f32 %v1236_v48, %v1206_v55 }
 0x272   : > { %v1238_v20 = vadd.f32 %v1237_v0, %v1207_v54 }
 0x274   : > { %v1239_v2 = vadd.f32 %v1238_v20, %v1208_v58 }
 0x276   : > { %1240 = vst [vmem:[%s264_s11] sm:$0xff] %v1239_v2 }
 0x277   : > { %1761 = shalt.err (!%p1758_p0)
}
 0x278   : > { %s1762_s5 = scalar_lea.hbm %s2346_s30, 128  ;;  %s1766_s25 = scalar_lea.hbm %s2397_s3, 384 }
 0x279   : > { %p1763_p8 = scmp.ne.s32.totalorder %s2346_s30, %s1762_s5  ;;  %p1767_p12 = scmp.lt.u32.totalorder %s2346_s30, %s2397_s3 }
 0x27a   : > { %p1768_p1 = scmp.lt.u32.totalorder %s1766_s25, %s1762_s5  ;;  %p1770_p6 = scmp.lt.u32.totalorder %s1762_s5, %s2346_s30 }
 0x27b   : > { %p1764_p9 = pnand %p1763_p8, %p2421_p2 }
 0x27c   : > { %p1769_p7 = por %p1768_p1, %p1767_p12 }
 0x27d   : > { %p1765_p4 = pneg %p1764_p9 }
 0x27e   : > { %p1771_p11 = por %p1770_p6, %p1769_p7 }
 0x280   : > { %p1772_p13 = pnand %p1771_p11, %p1765_p4 }
 0x282   : > { %1775 = shalt.err (!%p1772_p13)
}
 0x283   : > { %1540 = dma.vmem_to_hbm [thread:$0]  (%p2421_p2), %s2348_s20, 128, %s2346_s30, %s1242_s23  }
 0x284 PF: > { %p1560_p10 = scmp.ge.s32.totalorder %s1838_s17, 2  ;;  %s1268_s8 = sand.u32 1, %s1818_s12  }
 0x285   : > { %p2422_p3 = scmp.ne.s32.totalorder %s2408_s4, 0  ;;  %s1269_s10 = scalar_lea.sflag [#allocation4], %s1268_s8 }
 0x287   : > { %p1554_p5 = pnand %p1560_p10, %p2422_p3 }
 0x289   : > { %1813 = dma.done.wait (!%p1554_p5), %s1269_s10, 128  }
 0x28a   : > { %1815 = vsyncadd (!%p1554_p5), %s1269_s10, 4294967168  ;;  %s20_s17 = sadd.s32 1, %s1838_s17   ;;  %s2423_s12 = smov %s1822_s13 }
 0x28b   : > { %p17_p0 = scmp.ge.s32.totalorder %s20_s17, 5   ;;  %s2424_s13 = smov %s1826_s14 }
 0x28c   : > { %s2425_s14 = smov %s1916_s24  ;;  %s2426_s15 = smov %s1834_s16 }
 0x28d   : > { %s2427_s16 = smov %s2429_s18  ;;  %19 = sbr.rel (!%p17_p0) target bundleno = 7 (0x7), region = 92 }
 0x294   :  { %1274 = vsyncpa [#allocation3], 1 }
 0x295   :  { %1276 = vsyncpa [#allocation3 + $0x1], 1 }
 0x296   :  { %1277 = vsyncpa [#allocation6], 1 }
 0x297   :  { %1278 = vsyncpa [#allocation4], 1 }
 0x298   :  { %1280 = vsyncpa [#allocation4 + $0x1], 1 }

</bundles_post_ra>
